<compile_context>
chip_gen: v7x
topology: tpu7x:2x2x1
jax: 0.10.0
libtpu: 0.0.40
codegen_flags: <defaults>
</compile_context>

<pallas_src>
import functools
import math

import jax
import jax.numpy as jnp
from jax import lax
from jax.experimental import pallas as pl
from jax.experimental.pallas import tpu as pltpu

BN_EPS = 1e-5
LANES = 128


def _round_up(x, m):
    return (x + m - 1) // m * m


# ---------------------------------------------------------------------------
# fused (conv-as-im2col matmul) + bias + ReLU + training-mode BatchNorm kernel
# ---------------------------------------------------------------------------
def _convblock_kernel(xcol_ref, w_ref, b_ref, g_ref, bt_ref, o_ref,
                      sum_ref, sq_ref, *, m_valid, tile_m):
    """Grid = (2 phases, n_row_tiles).

    phase 0 : y = relu(xcol @ w + b); accumulate per-channel sum / sum(y^2)
    phase 1 : recompute y, normalize with the (now global) batch statistics
    """
    phase = pl.program_id(0)
    tile = pl.program_id(1)

    # Single MXU matmul, K = kh*kw*Cin, bf16 operands, f32 accumulation.
    y = jnp.dot(xcol_ref[...], w_ref[...], preferred_element_type=jnp.float32)
    y = jnp.maximum(y + b_ref[...], 0.0)          # bias + ReLU (f32, pre-BN)

    @pl.when(jnp.logical_and(phase == 0, tile == 0))
    def _init():
        sum_ref[...] = jnp.zeros_like(sum_ref)
        sq_ref[...] = jnp.zeros_like(sq_ref)

    @pl.when(phase == 0)
    def _accumulate():
        # mask rows that exist only because M was padded to a tile multiple
        row = tile * tile_m + lax.broadcasted_iota(jnp.int32, (tile_m, 1), 0)
        valid = (row < m_valid).astype(jnp.float32)
        ym = y * valid
        sum_ref[...] = sum_ref[...] + jnp.sum(ym, axis=0, keepdims=True)
        sq_ref[...] = sq_ref[...] + jnp.sum(ym * ym, axis=0, keepdims=True)
        o_ref[...] = y              # placeholder; overwritten in phase 1

    @pl.when(phase == 1)
    def _normalize():
        inv_m = 1.0 / m_valid
        mean = sum_ref[...] * inv_m
        var = sq_ref[...] * inv_m - mean * mean      # biased variance
        inv_std = lax.rsqrt(var + BN_EPS)
        o_ref[...] = (y - mean) * inv_std * g_ref[...] + bt_ref[...]


# ---------------------------------------------------------------------------
# wrapper: PyTorch-style NCHW in / NCHW out
# ---------------------------------------------------------------------------
def conv_block(x_nchw, weight, bias, gamma, beta, *,
               stride=1, padding=0, dilation=1, tile_m=256):
    """ConvBlock forward: Conv2d(k, stride, padding, dilation) -> ReLU ->
    BatchNorm2d (training mode, batch statistics, affine)."""
    N, Cin, H, W = x_nchw.shape
    Cout, _, kh, kw = weight.shape

    H_out = (H + 2 * padding - dilation * (kh - 1) - 1) // stride + 1
    W_out = (W + 2 * padding - dilation * (kw - 1) - 1) // stride + 1
    M = N * H_out * W_out
    K = kh * kw * Cin

    # ---- im2col in the wrapper (one XLA pad/slice/concat fusion) ----------
    x_nhwc = jnp.transpose(x_nchw, (0, 2, 3, 1)).astype(jnp.float32)
    xp = jnp.pad(x_nhwc, ((0, 0), (padding, padding), (padding, padding), (0, 0)))
    cols = []
    for dy in range(kh):
        for dx in range(kw):
            y0, x0 = dy * dilation, dx * dilation
            cols.append(lax.slice(
                xp, (0, y0, x0, 0),
                (N, y0 + (H_out - 1) * stride + 1,
                 x0 + (W_out - 1) * stride + 1, Cin),
                (1, stride, stride, 1)))
    xcol = jnp.concatenate(cols, axis=-1).reshape(M, K)   # (M, kh*kw*Cin)

    # ---- lane-dense / tile-aligned padding, bf16 MXU operands -------------
    c_pad = _round_up(Cout, LANES)
    tile_m = max(8, min(tile_m, _round_up(M, 8)))
    m_pad = _round_up(M, tile_m)
    n_tiles = m_pad // tile_m

    xcol = jnp.pad(xcol, ((0, m_pad - M), (0, 0))).astype(jnp.bfloat16)
    # PyTorch weight (Cout, Cin, kh, kw) -> (dy, dx, cin) x cout, matching im2col
    w_mat = jnp.transpose(weight, (2, 3, 1, 0)).reshape(K, Cout)
    w_mat = jnp.pad(w_mat, ((0, 0), (0, c_pad - Cout))).astype(jnp.bfloat16)
    b_row = jnp.pad(bias.reshape(1, Cout), ((0, 0), (0, c_pad - Cout))).astype(jnp.float32)
    g_row = jnp.pad(gamma.reshape(1, Cout), ((0, 0), (0, c_pad - Cout)),
                    constant_values=1.0).astype(jnp.float32)
    bt_row = jnp.pad(beta.reshape(1, Cout), ((0, 0), (0, c_pad - Cout))).astype(jnp.float32)

    kern = functools.partial(_convblock_kernel, m_valid=M, tile_m=tile_m)

    cost = pl.CostEstimate(
        flops=2 * 2 * m_pad * K * c_pad,                 # conv recomputed in phase 1
        transcendentals=n_tiles * c_pad,                 # rsqrt in phase 1
        bytes_accessed=(2 * xcol.size * 2 + w_mat.size * 2
                        + 3 * c_pad * 4 + m_pad * c_pad * 4))

    out = pl.pallas_call(
        kern,
        out_shape=jax.ShapeDtypeStruct((m_pad, c_pad), jnp.float32),
        grid_spec=pltpu.PrefetchScalarGridSpec(
            num_scalar_prefetch=0,
            grid=(2, n_tiles),                           # (phase, row tile)
            in_specs=[
                pl.BlockSpec((tile_m, K), lambda p, t: (t, 0)),
                pl.BlockSpec((K, c_pad), lambda p, t: (0, 0)),
                pl.BlockSpec((1, c_pad), lambda p, t: (0, 0)),
                pl.BlockSpec((1, c_pad), lambda p, t: (0, 0)),
                pl.BlockSpec((1, c_pad), lambda p, t: (0, 0)),
            ],
            out_specs=pl.BlockSpec((tile_m, c_pad), lambda p, t: (t, 0)),
            scratch_shapes=[pltpu.VMEM((1, c_pad), jnp.float32),   # sum(y)
                            pltpu.VMEM((1, c_pad), jnp.float32)]), # sum(y^2)
        compiler_params=pltpu.CompilerParams(
            # Both axes sequential: phase 0 must finish before phase 1 and the
            # BN statistics scratch is shared across tiles.
            # TODO(synk): for v7x megacore, shard the tile axis across the two
            # TensorCores with an explicit cross-core (CMEM/semaphore) reduce
            # of sum/sumsq before phase 1.
            dimension_semantics=("arbitrary", "arbitrary"),
            vmem_limit_bytes=32 * 1024 * 1024),
        cost_estimate=cost,
    )(xcol, w_mat, b_row, g_row, bt_row)

    out = out[:M, :Cout].reshape(N, H_out, W_out, Cout)
    return jnp.transpose(out, (0, 3, 1, 2))              # back to NCHW


# ---------------- deterministic parameter init (PyTorch-like) --------------
def init_params(key, cin, cout, k=3):
    ks = jax.random.split(key, 2)
    bound = 1.0 / math.sqrt(cin * k * k)
    w = jax.random.uniform(ks[0], (cout, cin, k, k), jnp.float32, -bound, bound)
    b = jax.random.uniform(ks[1], (cout,), jnp.float32, -bound, bound)
    gamma = jnp.ones((cout,), jnp.float32)
    beta = jnp.zeros((cout,), jnp.float32)
    return w, b, gamma, beta


# ---------------- pure-JAX reference (same bf16 MXU-operand rounding) -------
def conv_block_ref(x_nchw, weight, bias, gamma, beta, *, stride, padding, dilation):
    x = jnp.transpose(x_nchw, (0, 2, 3, 1)).astype(jnp.bfloat16)
    w = jnp.transpose(weight, (2, 3, 1, 0)).astype(jnp.bfloat16)   # HWIO
    y = lax.conv_general_dilated(
        x, w, window_strides=(stride, stride),
        padding=[(padding, padding), (padding, padding)],
        rhs_dilation=(dilation, dilation),
        dimension_numbers=("NHWC", "HWIO", "NHWC"),
        preferred_element_type=jnp.float32)
    y = jnp.maximum(y + bias.astype(jnp.float32), 0.0)
    mean = jnp.mean(y, axis=(0, 1, 2), keepdims=True)
    var = jnp.mean(jnp.square(y - mean), axis=(0, 1, 2), keepdims=True)
    y = (y - mean) * lax.rsqrt(var + BN_EPS) * gamma + beta
    return jnp.transpose(y, (0, 3, 1, 2))


if __name__ == "__main__":
    key = jax.random.PRNGKey(0)
    k_x, k_p = jax.random.split(key)

    # ConvBlock(4, 8, kernel_size=3, stride=1, padding=1, dilation=1)
    N, Cin, H, W = 2, 4, 16, 16
    Cout, ksize, stride, padding, dilation = 8, 3, 1, 1, 1

    x = jax.random.normal(k_x, (N, Cin, H, W), jnp.float32)
    w, b, g, bt = init_params(k_p, Cin, Cout, ksize)

    run = jax.jit(functools.partial(conv_block, stride=stride,
                                    padding=padding, dilation=dilation))
    out = jax.block_until_ready(run(x, w, b, g, bt))
    ref = jax.block_until_ready(conv_block_ref(x, w, b, g, bt, stride=stride,
                                               padding=padding, dilation=dilation))

    assert out.shape == (N, Cout, H, W), out.shape
    max_err = float(jnp.max(jnp.abs(out - ref)))
    assert jnp.allclose(out, ref, atol=1e-3, rtol=1e-3), max_err
    print("KERNEL_OK")
</pallas_src>

<mosaic_0001>
module attributes {stable_mosaic.version = 11 : i64} {
  func.func @_convblock_kernel(%arg0: i32, %arg1: i32, %arg2: memref<256x36xbf16, #tpu.memory_space<vmem>>, %arg3: memref<36x128xbf16, #tpu.memory_space<vmem>>, %arg4: memref<1x128xf32, #tpu.memory_space<vmem>>, %arg5: memref<1x128xf32, #tpu.memory_space<vmem>>, %arg6: memref<1x128xf32, #tpu.memory_space<vmem>>, %arg7: memref<256x128xf32, #tpu.memory_space<vmem>>, %arg8: memref<1x128xf32, #tpu.memory_space<vmem>>, %arg9: memref<1x128xf32, #tpu.memory_space<vmem>>) attributes {dimension_semantics = [#tpu.dimension_semantics<arbitrary>, #tpu.dimension_semantics<arbitrary>], iteration_bounds = array<i64: 2, 2>, scalar_prefetch = 0 : i64, scratch_operands = 2 : i64, tpu.core_type = #tpu.core_type<tc>, window_params = [{transform_indices = @transform_0, window_bounds = array<i64: 256, 36>}, {pipeline_mode = #tpu.pipeline_mode<synchronous>, transform_indices = @transform_1, window_bounds = array<i64: 36, 128>}, {pipeline_mode = #tpu.pipeline_mode<synchronous>, transform_indices = @transform_2, window_bounds = array<i64: 1, 128>}, {pipeline_mode = #tpu.pipeline_mode<synchronous>, transform_indices = @transform_3, window_bounds = array<i64: 1, 128>}, {pipeline_mode = #tpu.pipeline_mode<synchronous>, transform_indices = @transform_4, window_bounds = array<i64: 1, 128>}, {transform_indices = @transform_5, window_bounds = array<i64: 256, 128>}]} {
    %c0 = arith.constant 0 : index
    %c0_0 = arith.constant 0 : index
    %0 = vector.load %arg2[%c0, %c0_0] : memref<256x36xbf16, #tpu.memory_space<vmem>>, vector<256x36xbf16>
    %c0_1 = arith.constant 0 : index
    %c0_2 = arith.constant 0 : index
    %1 = vector.load %arg3[%c0_1, %c0_2] : memref<36x128xbf16, #tpu.memory_space<vmem>>, vector<36x128xbf16>
    %cst = arith.constant dense<0.000000e+00> : vector<256x128xf32>
    %2 = tpu.matmul %0, %1, %cst {dimension_numbers = #tpu.dot_dimension_numbers<[1], [0], [0], [1], [0, 0, 1, 1], [], []>} : vector<256x36xbf16>, vector<36x128xbf16>, vector<256x128xf32> -> vector<256x128xf32>
    %c0_3 = arith.constant 0 : index
    %c0_4 = arith.constant 0 : index
    %3 = vector.load %arg4[%c0_3, %c0_4] : memref<1x128xf32, #tpu.memory_space<vmem>>, vector<1x128xf32>
    %4 = vector.broadcast %3 : vector<1x128xf32> to vector<256x128xf32>
    %5 = arith.addf %2, %4 : vector<256x128xf32>
    %cst_5 = arith.constant 0.000000e+00 : f32
    %6 = vector.broadcast %cst_5 : f32 to vector<256x128xf32>
    %7 = arith.maximumf %5, %6 : vector<256x128xf32>
    %c0_i32 = arith.constant 0 : i32
    %8 = arith.cmpi eq, %arg0, %c0_i32 : i32
    %c0_i32_6 = arith.constant 0 : i32
    %9 = arith.cmpi eq, %arg1, %c0_i32_6 : i32
    %10 = arith.andi %8, %9 : i1
    %11 = arith.extui %10 : i1 to i32
    %c0_i32_7 = arith.constant 0 : i32
    %12 = arith.cmpi ne, %11, %c0_i32_7 : i32
    scf.if %12 {
      %cst_11 = arith.constant 0.000000e+00 : f32
      %19 = vector.broadcast %cst_11 : f32 to vector<1x128xf32>
      %c0_12 = arith.constant 0 : index
      %c0_13 = arith.constant 0 : index
      %20 = vector.load %arg8[%c0_12, %c0_13] : memref<1x128xf32, #tpu.memory_space<vmem>>, vector<1x128xf32>
      tpu.vector_store %arg8[%c0_12, %c0_13], %19 {strides = array<i32>} : memref<1x128xf32, #tpu.memory_space<vmem>>, vector<1x128xf32>,
      %cst_14 = arith.constant 0.000000e+00 : f32
      %21 = vector.broadcast %cst_14 : f32 to vector<1x128xf32>
      %c0_15 = arith.constant 0 : index
      %c0_16 = arith.constant 0 : index
      %22 = vector.load %arg9[%c0_15, %c0_16] : memref<1x128xf32, #tpu.memory_space<vmem>>, vector<1x128xf32>
      tpu.vector_store %arg9[%c0_15, %c0_16], %21 {strides = array<i32>} : memref<1x128xf32, #tpu.memory_space<vmem>>, vector<1x128xf32>,
    } else {
    }
    %c0_i32_8 = arith.constant 0 : i32
    %13 = arith.cmpi eq, %arg0, %c0_i32_8 : i32
    %14 = arith.extui %13 : i1 to i32
    %c0_i32_9 = arith.constant 0 : i32
    %15 = arith.cmpi ne, %14, %c0_i32_9 : i32
    scf.if %15 {
      %c256_i32 = arith.constant 256 : i32
      %19 = arith.muli %arg1, %c256_i32 : i32
      %20 = tpu.iota {dimensions = array<i32: 0>} : vector<256x1xi32>
      %21 = vector.broadcast %19 : i32 to vector<256x1xi32>
      %22 = arith.addi %21, %20 : vector<256x1xi32>
      %c512_i32 = arith.constant 512 : i32
      %23 = vector.broadcast %c512_i32 : i32 to vector<256x1xi32>
      %24 = arith.cmpi slt, %22, %23 : vector<256x1xi32>
      %25 = arith.extui %24 : vector<256x1xi1> to vector<256x1xi32>
      %26 = arith.sitofp %25 : vector<256x1xi32> to vector<256x1xf32>
      %27 = vector.broadcast %26 : vector<256x1xf32> to vector<256x128xf32>
      %28 = arith.mulf %7, %27 : vector<256x128xf32>
      %c0_11 = arith.constant 0 : index
      %c0_12 = arith.constant 0 : index
      %29 = vector.load %arg8[%c0_11, %c0_12] : memref<1x128xf32, #tpu.memory_space<vmem>>, vector<1x128xf32>
      %cst_13 = arith.constant dense<0.000000e+00> : vector<128xf32>
      %30 = vector.multi_reduction <add>, %28, %cst_13 [0] : vector<256x128xf32> to vector<128xf32>
      %31 = vector.shape_cast %30 : vector<128xf32> to vector<1x128xf32>
      %32 = arith.addf %29, %31 : vector<1x128xf32>
      %c0_14 = arith.constant 0 : index
      %c0_15 = arith.constant 0 : index
      %33 = vector.load %arg8[%c0_14, %c0_15] : memref<1x128xf32, #tpu.memory_space<vmem>>, vector<1x128xf32>
      tpu.vector_store %arg8[%c0_14, %c0_15], %32 {strides = array<i32>} : memref<1x128xf32, #tpu.memory_space<vmem>>, vector<1x128xf32>,
      %c0_16 = arith.constant 0 : index
      %c0_17 = arith.constant 0 : index
      %34 = vector.load %arg9[%c0_16, %c0_17] : memref<1x128xf32, #tpu.memory_space<vmem>>, vector<1x128xf32>
      %35 = arith.mulf %28, %28 : vector<256x128xf32>
      %cst_18 = arith.constant dense<0.000000e+00> : vector<128xf32>
      %36 = vector.multi_reduction <add>, %35, %cst_18 [0] : vector<256x128xf32> to vector<128xf32>
      %37 = vector.shape_cast %36 : vector<128xf32> to vector<1x128xf32>
      %38 = arith.addf %34, %37 : vector<1x128xf32>
      %c0_19 = arith.constant 0 : index
      %c0_20 = arith.constant 0 : index
      %39 = vector.load %arg9[%c0_19, %c0_20] : memref<1x128xf32, #tpu.memory_space<vmem>>, vector<1x128xf32>
      tpu.vector_store %arg9[%c0_19, %c0_20], %38 {strides = array<i32>} : memref<1x128xf32, #tpu.memory_space<vmem>>, vector<1x128xf32>,
      %c0_21 = arith.constant 0 : index
      %c0_22 = arith.constant 0 : index
      %40 = vector.load %arg7[%c0_21, %c0_22] : memref<256x128xf32, #tpu.memory_space<vmem>>, vector<256x128xf32>
      tpu.vector_store %arg7[%c0_21, %c0_22], %7 {strides = array<i32>} : memref<256x128xf32, #tpu.memory_space<vmem>>, vector<256x128xf32>,
    } else {
    }
    %c1_i32 = arith.constant 1 : i32
    %16 = arith.cmpi eq, %arg0, %c1_i32 : i32
    %17 = arith.extui %16 : i1 to i32
    %c0_i32_10 = arith.constant 0 : i32
    %18 = arith.cmpi ne, %17, %c0_i32_10 : i32
    scf.if %18 {
      %c0_11 = arith.constant 0 : index
      %c0_12 = arith.constant 0 : index
      %19 = vector.load %arg8[%c0_11, %c0_12] : memref<1x128xf32, #tpu.memory_space<vmem>>, vector<1x128xf32>
      %cst_13 = arith.constant 0.001953125 : f32
      %20 = vector.broadcast %cst_13 : f32 to vector<1x128xf32>
      %21 = arith.mulf %19, %20 : vector<1x128xf32>
      %c0_14 = arith.constant 0 : index
      %c0_15 = arith.constant 0 : index
      %22 = vector.load %arg9[%c0_14, %c0_15] : memref<1x128xf32, #tpu.memory_space<vmem>>, vector<1x128xf32>
      %cst_16 = arith.constant 0.001953125 : f32
      %23 = vector.broadcast %cst_16 : f32 to vector<1x128xf32>
      %24 = arith.mulf %22, %23 : vector<1x128xf32>
      %25 = arith.mulf %21, %21 : vector<1x128xf32>
      %26 = arith.subf %24, %25 : vector<1x128xf32>
      %cst_17 = arith.constant 9.99999974E-6 : f32
      %27 = vector.broadcast %cst_17 : f32 to vector<1x128xf32>
      %28 = arith.addf %26, %27 : vector<1x128xf32>
      %29 = math.rsqrt %28 : vector<1x128xf32>
      %30 = vector.broadcast %21 : vector<1x128xf32> to vector<256x128xf32>
      %31 = arith.subf %7, %30 : vector<256x128xf32>
      %32 = vector.broadcast %29 : vector<1x128xf32> to vector<256x128xf32>
      %33 = arith.mulf %31, %32 : vector<256x128xf32>
      %c0_18 = arith.constant 0 : index
      %c0_19 = arith.constant 0 : index
      %34 = vector.load %arg5[%c0_18, %c0_19] : memref<1x128xf32, #tpu.memory_space<vmem>>, vector<1x128xf32>
      %35 = vector.broadcast %34 : vector<1x128xf32> to vector<256x128xf32>
      %36 = arith.mulf %33, %35 : vector<256x128xf32>
      %c0_20 = arith.constant 0 : index
      %c0_21 = arith.constant 0 : index
      %37 = vector.load %arg6[%c0_20, %c0_21] : memref<1x128xf32, #tpu.memory_space<vmem>>, vector<1x128xf32>
      %38 = vector.broadcast %37 : vector<1x128xf32> to vector<256x128xf32>
      %39 = arith.addf %36, %38 : vector<256x128xf32>
      %c0_22 = arith.constant 0 : index
      %c0_23 = arith.constant 0 : index
      %40 = vector.load %arg7[%c0_22, %c0_23] : memref<256x128xf32, #tpu.memory_space<vmem>>, vector<256x128xf32>
      tpu.vector_store %arg7[%c0_22, %c0_23], %39 {strides = array<i32>} : memref<256x128xf32, #tpu.memory_space<vmem>>, vector<256x128xf32>,
    } else {
    }
    return
  }
  func.func @transform_0(%arg0: i32, %arg1: i32) -> (i32, i32) {
    %c0_i32 = arith.constant 0 : i32
    %c0_i32_0 = arith.constant 0 : i32
    return %arg1, %c0_i32 : i32, i32
  }
  func.func @transform_1(%arg0: i32, %arg1: i32) -> (i32, i32) {
    %c0_i32 = arith.constant 0 : i32
    %c0_i32_0 = arith.constant 0 : i32
    %c0_i32_1 = arith.constant 0 : i32
    return %c0_i32, %c0_i32_0 : i32, i32
  }
  func.func @transform_2(%arg0: i32, %arg1: i32) -> (i32, i32) {
    %c0_i32 = arith.constant 0 : i32
    %c0_i32_0 = arith.constant 0 : i32
    %c0_i32_1 = arith.constant 0 : i32
    return %c0_i32, %c0_i32_0 : i32, i32
  }
  func.func @transform_3(%arg0: i32, %arg1: i32) -> (i32, i32) {
    %c0_i32 = arith.constant 0 : i32
    %c0_i32_0 = arith.constant 0 : i32
    %c0_i32_1 = arith.constant 0 : i32
    return %c0_i32, %c0_i32_0 : i32, i32
  }
  func.func @transform_4(%arg0: i32, %arg1: i32) -> (i32, i32) {
    %c0_i32 = arith.constant 0 : i32
    %c0_i32_0 = arith.constant 0 : i32
    %c0_i32_1 = arith.constant 0 : i32
    return %c0_i32, %c0_i32_0 : i32, i32
  }
  func.func @transform_5(%arg0: i32, %arg1: i32) -> (i32, i32) {
    %c0_i32 = arith.constant 0 : i32
    %c0_i32_0 = arith.constant 0 : i32
    return %arg1, %c0_i32 : i32, i32
  }
}

</mosaic_0001>

<bundles_post_ra>
// kernel: conv_block.1
= control target key start
LH: loop header
LB: loop body
LE: loop exit
PB: predicated region body
PF: predicated region fallthrough
CT: control target
= control target key end

     0   :  { %s1526_s18 = smov 0   ;;  %s1528_s19 = smov 0   ;;  %s2207_s0 = inlined_call_operand.vmem [shape: bf16[512,36], index: 0, kind: input, shape index: {}]   ;;  %s2208_s1 = inlined_call_operand.vmem [shape: bf16[36,128], index: 1, kind: input, shape index: {}]   ;;  %s2209_s2 = inlined_call_operand.vmem [shape: f32[1,128], index: 2, kind: input, shape index: {}]   ;;  %s2210_s3 = inlined_call_operand.vmem [shape: f32[1,128], index: 3, kind: input, shape index: {}]   ;;  %s2211_s4 = inlined_call_operand.vmem [shape: f32[1,128], index: 4, kind: input, shape index: {}]   ;;  %s2212_s5 = inlined_call_operand.vmem [shape: f32[512,128], index: 5, kind: output, shape index: {}]  }
   0x1   :  { %s1530_s20 = smov 0   ;;  %s1532_s21 = smov 0  }
   0x2   :  { %s1534_s22 = smov 0  }
   0x3 LB: > { %s24_s23 = sadd.s32 1, %s1484_s20  ;;  %s27_s24 = sadd.s32 1, %s1488_s21  ;;  %s1492_s22 = sphi %s1534_s22, %s15_s22   ;;  %s1488_s21 = sphi %s1532_s21, %s2217_s21   ;;  %s1484_s20 = sphi %s1530_s20, %s2216_s20   ;;  %s1480_s19 = sphi %s1528_s19, %s2215_s19   ;;  %s1476_s18 = sphi %s1526_s18, %s2214_s18  }
   0x4   : > { %p25_p0 = scmp.ge.s32.totalorder %s24_s23, 2  ;;  %p1246_p1 = scmp.ge.s32.totalorder %s1492_s22, 1 }
   0x5   : > { %p200_p2 = scmp.lt.s32.totalorder %s1492_s22, 5 }
   0x6   : > { %s2219_s23 = smov (%p25_p0, %s24_s23), 0  ;;  %s2221_s24 = smov (!%p25_p0, %s27_s24), %s1488_s21 }
   0x7   : > { %p201_p3 = pnand %p1246_p1, %p200_p2  ;;  %p29_p4 = scmp.ge.s32.totalorder %s2221_s24, 2 }
   0x8   : > { %v1433_v0 = vld [vmem:[%s2208_s1] sm:$0xff] (!%p201_p3)   ;;  %v1434_v1 = vld [vmem:[%s2208_s1 + $0x8] sm:$0xff] (!%p201_p3)   ;;  %s1247_s29 = sshll.u32 (!%p201_p3), %s1476_s18, 5  ;;  %v1435_v2 = vld [vmem:[%s2208_s1 + $0x10] ss:$0 sps:$4 sm:$0x33] (!%p201_p3)  }
   0x9   : > { %s2223_s24 = smov (%p29_p4, %s2221_s24), 0  ;;  %204 = sbr.rel (%p201_p3) target bundleno = 418 (0x1a2), region = 40 }
   0xa   : > { %1345 = vmatprep.subr.bf16.mxu0 (!%p201_p3), %v1433_v0  ;;  %1383 = vmatprep.subr.bf16.mxu1 (!%p201_p3), %v1433_v0  ;;  %p229_p5 = scmp.lt.s32.totalorder (!%p201_p3), %s1247_s29, 63  ;;  %vm429_vm0 = vcmask (!%p201_p3), 1041408   ;;  %vm380_vm1 = vcmask (!%p201_p3), 293888   ;;  %p626_p6 = scmp.eq.s32.totalorder (!%p201_p3), %s1480_s19, 0  ;;  %v1621_v20 = vld [vmem:[%s2209_s2] ss:$0 sm:$0xff] (!%p201_p3) }
   0xb   : > { %1346 = vmatpush3.bf16.msra.mxu0 (!%p201_p3), %v1433_v0  ;;  %1386 = vmatpush3.bf16.msra.mxu1 (!%p201_p3), %v1433_v0  ;;  %v431_v3 = vsel (!%p201_p3), %vm429_vm0, %v1435_v2, 0  ;;  %p627_p7 = scmp.eq.s32.totalorder (!%p201_p3), %s1476_s18, 0 }
   0xc   : > { %1347 = vmatprep.subr.bf16.mxu0 (!%p201_p3), %v1434_v1  ;;  %1384 = vmatprep.subr.bf16.mxu1 (!%p201_p3), %v1434_v1 }
   0xd   : > { %p1614_p8 = pnand (!%p201_p3), %p627_p7, %p626_p6 }
   0xf   : > { %1348 = vmatpush3.bf16.msra.mxu0 (!%p201_p3), %v1434_v1  ;;  %1387 = vmatpush3.bf16.msra.mxu1 (!%p201_p3), %v1434_v1 }
  0x10   : > { %s2225_s29 = smov (!%p229_p5, %s1247_s29), 63  ;;  %1389 = vmatprep.subr.msk.bf16.mxu0 %vm429_vm0, %v1435_v2  ;;  %1390 = vmatprep.subr.msk.bf16.mxu1 %vm429_vm0, %v1435_v2 }
  0x11   : > { %s1248_s7 = sshll.u32 %s2225_s29, 2  ;;  %s1250_s8 = sshll.u32 %s2225_s29, 3 }
  0x12   : > { %s1573_s11 = scalar_lea.vmem %s2207_s0, %s1248_s7  ;;  %s1578_s14 = scalar_lea.vmem %s2212_s5, %s1250_s8 }
  0x13   : > { %v1436_v4 = vld [vmem:[%s1573_s11] sm:$0xff]   ;;  %v1438_v6 = vld [vmem:[%s1573_s11 + $0x8] sm:$0xff]   ;;  %1350 = vmatpush3.bf16.msra.mxu0 %v431_v3  ;;  %1388 = vmatpush3.bf16.msra.mxu1 %v431_v3  ;;  %v1440_v8 = vld [vmem:[%s1573_s11 + $0x10] sm:$0xff]  }
  0x14   : > { %v1437_v5 = vld [vmem:[%s1573_s11 + $0x40] sm:$0xff]   ;;  %1351 = vmatprep.mubr.msk.bf16.mxu0 %vm380_vm1, %v1436_v4  ;;  %v1439_v7 = vld [vmem:[%s1573_s11 + $0x48] sm:$0xff]   ;;  %v1441_v9 = vld [vmem:[%s1573_s11 + $0x50] sm:$0xff]  }
  0x15   : > { %1367 = vmatprep.mubr.msk.bf16.mxu1 %vm380_vm1, %v1437_v5  ;;  %v1442_v10 = vld [vmem:[%s1573_s11 + $0x18] sm:$0xff]   ;;  %v1444_v12 = vld [vmem:[%s1573_s11 + $0x20] sm:$0xff]   ;;  %v1446_v14 = vld [vmem:[%s1573_s11 + $0x28] sm:$0xff]  }
  0x16   : > { %1352 = vmatmul.mubr.msk.bf16.vlgmr.msra.gmra.mrb[0].mxu0 %vm380_vm1, %v1438_v6  ;;  %1368 = vmatmul.mubr.msk.bf16.vlgmr.msra.gmra.mrb[0].mxu1 %vm380_vm1, %v1439_v7  ;;  %v1443_v11 = vld [vmem:[%s1573_s11 + $0x58] sm:$0xff]   ;;  %v1445_v13 = vld [vmem:[%s1573_s11 + $0x60] sm:$0xff]   ;;  %v1447_v15 = vld [vmem:[%s1573_s11 + $0x68] sm:$0xff]  }
  0x17   : > { %1355 = vmatprep.mubr.msk.bf16.mxu0 %vm380_vm1, %v1440_v8  ;;  %1371 = vmatprep.mubr.msk.bf16.mxu1 %vm380_vm1, %v1441_v9  ;;  %v1448_v16 = vld [vmem:[%s1573_s11 + $0x30] sm:$0xff]   ;;  %v1450_v18 = vld [vmem:[%s1573_s11 + $0x38] sm:$0xff]  }
  0x18   : > { %v1449_v17 = vld [vmem:[%s1573_s11 + $0x70] sm:$0xff]   ;;  %v1451_v19 = vld [vmem:[%s1573_s11 + $0x78] sm:$0xff]  }
  0x1e   : > { %1356 = vmatmul.mubr.msk.bf16.gmra.mrb[4].mxu0 %vm380_vm1, %v1442_v10  ;;  %1372 = vmatmul.mubr.msk.bf16.gmra.mrb[4].mxu1 %vm380_vm1, %v1443_v11 }
  0x1f   : > { %1359 = vmatprep.mubr.msk.bf16.mxu0 %vm380_vm1, %v1444_v12  ;;  %1375 = vmatprep.mubr.msk.bf16.mxu1 %vm380_vm1, %v1445_v13 }
  0x26   : > { %1360 = vmatmul.mubr.msk.bf16.gmra.mrb[8].mxu0 %vm380_vm1, %v1446_v14  ;;  %1376 = vmatmul.mubr.msk.bf16.gmra.mrb[8].mxu1 %vm380_vm1, %v1447_v15 }
  0x27   : > { %1363 = vmatprep.mubr.msk.bf16.mxu0 %vm380_vm1, %v1448_v16  ;;  %1379 = vmatprep.mubr.msk.bf16.mxu1 %vm380_vm1, %v1449_v17 }
  0x2e   : > { %1364 = vmatmul.mubr.msk.bf16.gmra.mrb[12].mxu0 %vm380_vm1, %v1450_v18  ;;  %1380 = vmatmul.mubr.msk.bf16.gmra.mrb[12].mxu1 %vm380_vm1, %v1451_v19 }
  0xe9   : > { %v1353_v21 = vpop.f32.mrb[0].mxu0  ;;  %v1369_v22 = vpop.f32.mrb[0].mxu1 }
  0xea   : > { %v476_v23 = vadd.f32 %v1353_v21, %v1621_v20  ;;  %v540_v24 = vadd.f32 %v1369_v22, %v1621_v20  ;;  %v467_v25 = vpop.f32.mrb[1].mxu0  ;;  %v531_v26 = vpop.f32.mrb[1].mxu1 }
  0xeb   : > { %v468_v27 = vadd.f32 %v1621_v20, %v467_v25  ;;  %v532_v28 = vadd.f32 %v1621_v20, %v531_v26  ;;  %v1354_v29 = vpop.f32.mrb[2].mxu0  ;;  %v1370_v30 = vpop.f32.mrb[2].mxu1 }
  0xec   : > { %v1627_v31 = vmax.f32 %v476_v23, 0.0  ;;  %v1629_v32 = vmax.f32 %v540_v24, 0.0  ;;  %v479_v33 = vadd.f32 %v1354_v29, %v1621_v20  ;;  %v543_v34 = vadd.f32 %v1370_v30, %v1621_v20  ;;  %v470_v35 = vpop.f32.mrb[3].mxu0  ;;  %v534_v36 = vpop.f32.mrb[3].mxu1 }
  0xed   : > { %v1633_v37 = vmax.f32 %v468_v27, 0.0  ;;  %v1635_v38 = vmax.f32 %v532_v28, 0.0  ;;  %v471_v39 = vadd.f32 %v1621_v20, %v470_v35  ;;  %v535_v40 = vadd.f32 %v1621_v20, %v534_v36 }
  0xee   : > { %v1639_v41 = vmax.f32 %v479_v33, 0.0  ;;  %v1641_v42 = vmax.f32 %v543_v34, 0.0 }
  0xef   : > { %v1643_v43 = vmax.f32 %v471_v39, 0.0  ;;  %v1645_v44 = vmax.f32 %v535_v40, 0.0 }
  0xf1   : > { %v1357_v45 = vpop.f32.mrb[4].mxu0  ;;  %v1373_v46 = vpop.f32.mrb[4].mxu1 }
  0xf2   : > { %v492_v47 = vadd.f32 %v1357_v45, %v1621_v20  ;;  %v556_v48 = vadd.f32 %v1373_v46, %v1621_v20  ;;  %v483_v49 = vpop.f32.mrb[5].mxu0  ;;  %v547_v50 = vpop.f32.mrb[5].mxu1 }
  0xf3   : > { %v484_v51 = vadd.f32 %v1621_v20, %v483_v49  ;;  %v548_v52 = vadd.f32 %v1621_v20, %v547_v50  ;;  %v1358_v53 = vpop.f32.mrb[6].mxu0  ;;  %v1374_v54 = vpop.f32.mrb[6].mxu1 }
  0xf4   : > { %v1651_v55 = vmax.f32 %v492_v47, 0.0  ;;  %v1653_v56 = vmax.f32 %v556_v48, 0.0  ;;  %v495_v57 = vadd.f32 %v1358_v53, %v1621_v20  ;;  %v559_v58 = vadd.f32 %v1374_v54, %v1621_v20  ;;  %v486_v59 = vpop.f32.mrb[7].mxu0  ;;  %v550_v60 = vpop.f32.mrb[7].mxu1 }
  0xf5   : > { %v1657_v61 = vmax.f32 %v484_v51, 0.0  ;;  %v1659_v62 = vmax.f32 %v548_v52, 0.0  ;;  %v487_v63 = vadd.f32 %v1621_v20, %v486_v59  ;;  %v551_v0 = vadd.f32 %v1621_v20, %v550_v60 }
  0xf6   : > { %v1663_v1 = vmax.f32 %v495_v57, 0.0  ;;  %v1665_v2 = vmax.f32 %v559_v58, 0.0 }
  0xf7   : > { %v1667_v3 = vmax.f32 %v487_v63, 0.0  ;;  %v1669_v4 = vmax.f32 %v551_v0, 0.0 }
  0xf9   : > { %v1361_v5 = vpop.f32.mrb[8].mxu0  ;;  %v1377_v6 = vpop.f32.mrb[8].mxu1 }
  0xfa   : > { %v508_v7 = vadd.f32 %v1361_v5, %v1621_v20  ;;  %v572_v8 = vadd.f32 %v1377_v6, %v1621_v20  ;;  %v499_v9 = vpop.f32.mrb[9].mxu0  ;;  %v563_v10 = vpop.f32.mrb[9].mxu1  ;;  %v1494_v6 = vmov (!%p1614_p8), 0.0  }
  0xfb   : > { %v500_v11 = vadd.f32 %v1621_v20, %v499_v9  ;;  %v564_v12 = vadd.f32 %v1621_v20, %v563_v10  ;;  %v1362_v13 = vpop.f32.mrb[10].mxu0  ;;  %v1378_v14 = vpop.f32.mrb[10].mxu1  ;;  %632 = vst [vmem:[#allocation2] sm:$0x1] (!%p1614_p8), %v1494_v6  ;;  %633 = vst [vmem:[#allocation3] sm:$0x1] (!%p1614_p8), %v1494_v6 }
  0xfc   : > { %v1675_v15 = vmax.f32 %v508_v7, 0.0  ;;  %v1677_v16 = vmax.f32 %v572_v8, 0.0  ;;  %v511_v17 = vadd.f32 %v1362_v13, %v1621_v20  ;;  %v575_v18 = vadd.f32 %v1378_v14, %v1621_v20  ;;  %v502_v19 = vpop.f32.mrb[11].mxu0  ;;  %v566_v21 = vpop.f32.mrb[11].mxu1 }
  0xfd   : > { %v1681_v22 = vmax.f32 %v500_v11, 0.0  ;;  %v1683_v23 = vmax.f32 %v564_v12, 0.0  ;;  %v503_v24 = vadd.f32 %v1621_v20, %v502_v19  ;;  %v567_v25 = vadd.f32 %v1621_v20, %v566_v21 }
  0xfe   : > { %v1687_v26 = vmax.f32 %v511_v17, 0.0  ;;  %v1689_v27 = vmax.f32 %v575_v18, 0.0 }
  0xff   : > { %v1691_v28 = vmax.f32 %v503_v24, 0.0  ;;  %v1693_v29 = vmax.f32 %v567_v25, 0.0 }
 0x101   : > { %v1365_v30 = vpop.f32.mrb[12].mxu0  ;;  %v1381_v33 = vpop.f32.mrb[12].mxu1  ;;  %631 = sbr.rel (%p1614_p8) target bundleno = 264 (0x108), region = 44 }
 0x102   : > { %v524_v34 = vadd.f32 %v1365_v30, %v1621_v20  ;;  %v588_v35 = vadd.f32 %v1381_v33, %v1621_v20  ;;  %v515_v36 = vpop.f32.mrb[13].mxu0  ;;  %v579_v39 = vpop.f32.mrb[13].mxu1 }
 0x103   : > { %v516_v40 = vadd.f32 %v1621_v20, %v515_v36  ;;  %v580_v45 = vadd.f32 %v1621_v20, %v579_v39  ;;  %v1366_v46 = vpop.f32.mrb[14].mxu0  ;;  %v1382_v47 = vpop.f32.mrb[14].mxu1 }
 0x104   : > { %v1699_v48 = vmax.f32 %v524_v34, 0.0  ;;  %v1701_v49 = vmax.f32 %v588_v35, 0.0  ;;  %v527_v50 = vadd.f32 %v1366_v46, %v1621_v20  ;;  %v591_v51 = vadd.f32 %v1382_v47, %v1621_v20  ;;  %v518_v52 = vpop.f32.mrb[15].mxu0  ;;  %v582_v53 = vpop.f32.mrb[15].mxu1 }
 0x105   : > { %v1705_v54 = vmax.f32 %v516_v40, 0.0  ;;  %v1707_v57 = vmax.f32 %v580_v45, 0.0  ;;  %v519_v58 = vadd.f32 %v1621_v20, %v518_v52  ;;  %v583_v59 = vadd.f32 %v1621_v20, %v582_v53 }
 0x106   : > { %v1711_v60 = vmax.f32 %v527_v50, 0.0  ;;  %v1713_v63 = vmax.f32 %v591_v51, 0.0 }
 0x107   : > { %v1715_v0 = vmax.f32 %v519_v58, 0.0  ;;  %v1717_v5 = vmax.f32 %v583_v59, 0.0 }
 0x108 PF: > { %p1287_p9 = scmp.ne.s32.totalorder %s1480_s19, 0 }
 0x109   : > { %944 = vst [vmem:[%s1578_s14] sm:$0xff] (!%p1287_p9), %v1633_v37  ;;  %945 = vst [vmem:[%s1578_s14 + $0x8] sm:$0xff] (!%p1287_p9), %v1643_v43  ;;  %v638_v20 = vlaneseq (!%p1287_p9)  ;;  %s1288_s25 = sshll.u32 (!%p1287_p9), %s1476_s18, 8  ;;  %v1495_v25 = vmov (!%p1287_p9), 0.0  }
 0x10a   : > { %636 = sbr.rel (%p1287_p9) target bundleno = 361 (0x169), region = 48  ;;  %946 = vst [vmem:[%s1578_s14 + $0x10] sm:$0xff] (!%p1287_p9), %v1627_v31  ;;  %947 = vst [vmem:[%s1578_s14 + $0x18] sm:$0xff] (!%p1287_p9), %v1639_v41  ;;  %v1790_v9 = vstv (!%p1287_p9), %s1288_s25 }
 0x10b   : > { %948 = vst [vmem:[%s1578_s14 + $0x20] sm:$0xff] (!%p1287_p9), %v1657_v61  ;;  %949 = vst [vmem:[%s1578_s14 + $0x28] sm:$0xff] (!%p1287_p9), %v1667_v3  ;;  %v1786_v7 = vshrl.u32 (!%p1287_p9), %v638_v20, 7 }
 0x10c   : > { %950 = vst [vmem:[%s1578_s14 + $0x30] sm:$0xff] (!%p1287_p9), %v1651_v55  ;;  %951 = vst [vmem:[%s1578_s14 + $0x38] sm:$0xff] (!%p1287_p9), %v1663_v1 }
 0x10d   : > { %952 = vst [vmem:[%s1578_s14 + $0x40] sm:$0xff] (!%p1287_p9), %v1681_v22  ;;  %953 = vst [vmem:[%s1578_s14 + $0x48] sm:$0xff] (!%p1287_p9), %v1691_v28  ;;  %v640_v8 = vadd.s32 (!%p1287_p9), 8, %v1786_v7  ;;  %v641_v10 = vadd.s32 (!%p1287_p9), 16, %v1786_v7  ;;  %v642_v11 = vadd.s32 (!%p1287_p9), 24, %v1786_v7  ;;  %v672_v12 = vadd.s32 (!%p1287_p9), %v1790_v9, %v1786_v7 }
 0x10e   : > { %954 = vst [vmem:[%s1578_s14 + $0x50] sm:$0xff] (!%p1287_p9), %v1675_v15  ;;  %955 = vst [vmem:[%s1578_s14 + $0x58] sm:$0xff] (!%p1287_p9), %v1687_v26  ;;  %v643_v14 = vadd.s32 (!%p1287_p9), 32, %v1786_v7  ;;  %v644_v18 = vadd.s32 (!%p1287_p9), 40, %v1786_v7  ;;  %v645_v21 = vadd.s32 (!%p1287_p9), 48, %v1786_v7  ;;  %v646_v34 = vadd.s32 (!%p1287_p9), 56, %v1786_v7 }
 0x10f   : > { %956 = vst [vmem:[%s1578_s14 + $0x60] sm:$0xff] (!%p1287_p9), %v1705_v54  ;;  %957 = vst [vmem:[%s1578_s14 + $0x68] sm:$0xff] (!%p1287_p9), %v1715_v0  ;;  %v673_v13 = vadd.s32 (!%p1287_p9), %v1790_v9, %v640_v8  ;;  %v674_v17 = vadd.s32 (!%p1287_p9), %v1790_v9, %v641_v10  ;;  %v675_v19 = vadd.s32 (!%p1287_p9), %v1790_v9, %v642_v11  ;;  %vm704_vm2 = vcmp.lt.s32.totalorder (!%p1287_p9), %v672_v12, 512 }
 0x110   : > { %958 = vst [vmem:[%s1578_s14 + $0x70] sm:$0xff] (!%p1287_p9), %v1699_v48  ;;  %959 = vst [vmem:[%s1578_s14 + $0x78] sm:$0xff] (!%p1287_p9), %v1711_v60  ;;  %v676_v24 = vadd.s32 (!%p1287_p9), %v1790_v9, %v643_v14  ;;  %v1289_v30 = vsel (!%p1287_p9), %vm704_vm2, 1.0, %v1495_v25  ;;  %v677_v35 = vadd.s32 (!%p1287_p9), %v1790_v9, %v644_v18  ;;  %v647_v36 = vadd.s32 (!%p1287_p9), 64, %v1786_v7 }
 0x111   : > { %960 = vst [vmem:[%s1578_s14 + $0x80] sm:$0xff] %v1635_v38  ;;  %961 = vst [vmem:[%s1578_s14 + $0x88] sm:$0xff] %v1645_v44  ;;  %vm705_vm3 = vcmp.lt.s32.totalorder %v673_v13, 512  ;;  %vm706_vm4 = vcmp.lt.s32.totalorder %v674_v17, 512  ;;  %vm707_vm5 = vcmp.lt.s32.totalorder %v675_v19, 512  ;;  %v678_v40 = vadd.s32 %v1790_v9, %v645_v21 }
 0x112   : > { %962 = vst [vmem:[%s1578_s14 + $0x90] sm:$0xff] %v1629_v32  ;;  %963 = vst [vmem:[%s1578_s14 + $0x98] sm:$0xff] %v1641_v42  ;;  %v1290_v33 = vsel %vm705_vm3, 1.0, %v1495_v25  ;;  %v1291_v39 = vsel %vm706_vm4, 1.0, %v1495_v25  ;;  %vm708_vm6 = vcmp.lt.s32.totalorder %v676_v24, 512  ;;  %v800_v45 = vmul.f32 %v1289_v30, %v1633_v37 }
 0x113   : > { %964 = vst [vmem:[%s1578_s14 + $0xa0] sm:$0xff] %v1659_v62  ;;  %965 = vst [vmem:[%s1578_s14 + $0xa8] sm:$0xff] %v1669_v4  ;;  %v801_v46 = vmul.f32 %v1290_v33, %v1643_v43  ;;  %v648_v47 = vadd.s32 72, %v1786_v7  ;;  %v1292_v50 = vsel %vm707_vm5, 1.0, %v1495_v25  ;;  %v679_v51 = vadd.s32 %v1790_v9, %v646_v34 }
 0x114   : > { %966 = vst [vmem:[%s1578_s14 + $0xb0] sm:$0xff] %v1653_v56  ;;  %967 = vst [vmem:[%s1578_s14 + $0xb8] sm:$0xff] %v1665_v2  ;;  %vm709_vm7 = vcmp.lt.s32.totalorder %v677_v35, 512  ;;  %v802_v52 = vmul.f32 %v1291_v39, %v1627_v31  ;;  %v649_v58 = vadd.s32 80, %v1786_v7  ;;  %v680_v59 = vadd.s32 %v1790_v9, %v647_v36 }
 0x115   : > { %968 = vst [vmem:[%s1578_s14 + $0xc0] sm:$0xff] %v1683_v23  ;;  %969 = vst [vmem:[%s1578_s14 + $0xc8] sm:$0xff] %v1693_v29  ;;  %v833_v53 = vadd.f32 %v801_v46, %v800_v45  ;;  %v1293_v6 = vsel %vm708_vm6, 1.0, %v1495_v25  ;;  %vm710_vm8 = vcmp.lt.s32.totalorder %v678_v40, 512  ;;  %v803_v20 = vmul.f32 %v1292_v50, %v1639_v41 }
 0x116   : > { %970 = vst [vmem:[%s1578_s14 + $0xd0] sm:$0xff] %v1677_v16  ;;  %971 = vst [vmem:[%s1578_s14 + $0xd8] sm:$0xff] %v1689_v27  ;;  %v650_v10 = vadd.s32 88, %v1786_v7  ;;  %v1294_v11 = vsel %vm709_vm7, 1.0, %v1495_v25  ;;  %v681_v12 = vadd.s32 %v1790_v9, %v648_v47  ;;  %vm711_vm9 = vcmp.lt.s32.totalorder %v679_v51, 512 }
 0x117   : > { %972 = vst [vmem:[%s1578_s14 + $0xe0] sm:$0xff] %v1707_v57  ;;  %973 = vst [vmem:[%s1578_s14 + $0xe8] sm:$0xff] %v1717_v5  ;;  %v834_v8 = vadd.f32 %v833_v53, %v802_v52  ;;  %v804_v13 = vmul.f32 %v1293_v6, %v1657_v61  ;;  %v651_v17 = vadd.s32 96, %v1786_v7  ;;  %v682_v18 = vadd.s32 %v1790_v9, %v649_v58 }
 0x118   : > { %974 = vst [vmem:[%s1578_s14 + $0xf0] sm:$0xff] %v1701_v49  ;;  %975 = vst [vmem:[%s1578_s14 + $0xf8] sm:$0xff] %v1713_v63  ;;  %vm712_vm10 = vcmp.lt.s32.totalorder %v680_v59, 512  ;;  %v1295_v19 = vsel %vm710_vm8, 1.0, %v1495_v25  ;;  %v805_v21 = vmul.f32 %v1294_v11, %v1667_v3  ;;  %v873_v30 = vmul.f32 %v800_v45, %v800_v45 }
 0x119   : > { %v835_v14 = vadd.f32 %v834_v8, %v803_v20  ;;  %v874_v33 = vmul.f32 %v801_v46, %v801_v46  ;;  %v652_v34 = vadd.s32 104, %v1786_v7  ;;  %v683_v35 = vadd.s32 %v1790_v9, %v650_v10 }
 0x11a   : > { %v1296_v36 = vsel %vm711_vm9, 1.0, %v1495_v25  ;;  %vm713_vm11 = vcmp.lt.s32.totalorder %v681_v12, 512  ;;  %v806_v39 = vmul.f32 %v1295_v19, %v1651_v55  ;;  %v875_v47 = vmul.f32 %v802_v52, %v802_v52 }
 0x11b   : > { %v836_v24 = vadd.f32 %v835_v14, %v804_v13  ;;  %v653_v50 = vadd.s32 112, %v1786_v7  ;;  %v684_v51 = vadd.s32 %v1790_v9, %v651_v17  ;;  %vm714_vm12 = vcmp.lt.s32.totalorder %v682_v18, 512 }
 0x11c   : > { %v1297_v45 = vsel %vm712_vm10, 1.0, %v1495_v25  ;;  %v807_v46 = vmul.f32 %v1296_v36, %v1663_v1  ;;  %v876_v58 = vmul.f32 %v803_v20, %v803_v20  ;;  %v905_v6 = vadd.f32 %v874_v33, %v873_v30 }
 0x11d   : > { %v837_v40 = vadd.f32 %v836_v24, %v805_v21  ;;  %v654_v8 = vadd.s32 120, %v1786_v7  ;;  %v685_v10 = vadd.s32 %v1790_v9, %v652_v34  ;;  %vm715_vm13 = vcmp.lt.s32.totalorder %v683_v35, 512 }
 0x11e   : > { %v1298_v52 = vsel %vm713_vm11, 1.0, %v1495_v25  ;;  %v808_v11 = vmul.f32 %v1297_v45, %v1681_v22  ;;  %v877_v14 = vmul.f32 %v804_v13, %v804_v13  ;;  %v906_v17 = vadd.f32 %v905_v6, %v875_v47 }
 0x11f   : > { %v838_v53 = vadd.f32 %v837_v40, %v806_v39  ;;  %v655_v59 = vadd.s32 128, %v1786_v7  ;;  %v686_v19 = vadd.s32 %v1790_v9, %v653_v50  ;;  %vm716_vm14 = vcmp.lt.s32.totalorder %v684_v51, 512 }
 0x120   : > { %v1299_v20 = vsel %vm714_vm12, 1.0, %v1495_v25  ;;  %v809_v24 = vmul.f32 %v1298_v52, %v1691_v28  ;;  %v878_v33 = vmul.f32 %v805_v21, %v805_v21  ;;  %v907_v34 = vadd.f32 %v906_v17, %v876_v58 }
 0x121   : > { %v839_v12 = vadd.f32 %v838_v53, %v807_v46  ;;  %v656_v36 = vadd.s32 136, %v1786_v7  ;;  %v687_v40 = vadd.s32 %v1790_v9, %v654_v8  ;;  %vm717_vm15 = vcmp.lt.s32.totalorder %v685_v10, 512 }
 0x122   : > { %v1300_v13 = vsel %vm715_vm13, 1.0, %v1495_v25  ;;  %v810_v47 = vmul.f32 %v1299_v20, %v1675_v15  ;;  %v879_v45 = vmul.f32 %v806_v39, %v806_v39  ;;  %v908_v53 = vadd.f32 %v907_v34, %v877_v14 }
 0x123   : > { %v840_v30 = vadd.f32 %v839_v12, %v808_v11  ;;  %v657_v18 = vadd.s32 144, %v1786_v7  ;;  %v688_v6 = vadd.s32 %v1790_v9, %v655_v59  ;;  %vm718_vm0 = vcmp.lt.s32.totalorder %v686_v19, 512 }
 0x124   : > { %v1301_v21 = vsel %vm716_vm14, 1.0, %v1495_v25  ;;  %v811_v58 = vmul.f32 %v1300_v13, %v1687_v26  ;;  %v880_v52 = vmul.f32 %v807_v46, %v807_v46  ;;  %v909_v12 = vadd.f32 %v908_v53, %v878_v33 }
 0x125   : > { %v841_v50 = vadd.f32 %v840_v30, %v809_v24  ;;  %v658_v35 = vadd.s32 152, %v1786_v7  ;;  %v689_v17 = vadd.s32 %v1790_v9, %v656_v36  ;;  %vm719_vm1 = vcmp.lt.s32.totalorder %v687_v40, 512 }
 0x126   : > { %v1302_v39 = vsel %vm717_vm15, 1.0, %v1495_v25  ;;  %v812_v14 = vmul.f32 %v1301_v21, %v1705_v54  ;;  %v881_v20 = vmul.f32 %v808_v11, %v808_v11  ;;  %v910_v30 = vadd.f32 %v909_v12, %v879_v45 }
 0x127   : > { %v842_v8 = vadd.f32 %v841_v50, %v810_v47  ;;  %v659_v51 = vadd.s32 160, %v1786_v7  ;;  %v690_v34 = vadd.s32 %v1790_v9, %v657_v18  ;;  %vm720_vm2 = vcmp.lt.s32.totalorder %v688_v6, 512 }
 0x128   : > { %v1303_v46 = vsel %vm718_vm0, 1.0, %v1495_v25  ;;  %v813_v33 = vmul.f32 %v1302_v39, %v1715_v0  ;;  %v882_v13 = vmul.f32 %v809_v24, %v809_v24  ;;  %v911_v50 = vadd.f32 %v910_v30, %v880_v52 }
 0x129   : > { %v843_v59 = vadd.f32 %v842_v8, %v811_v58  ;;  %v660_v10 = vadd.s32 168, %v1786_v7  ;;  %v691_v53 = vadd.s32 %v1790_v9, %v658_v35  ;;  %vm721_vm3 = vcmp.lt.s32.totalorder %v689_v17, 512 }
 0x12a   : > { %v1304_v11 = vsel %vm719_vm1, 1.0, %v1495_v25  ;;  %v814_v45 = vmul.f32 %v1303_v46, %v1699_v48  ;;  %v883_v21 = vmul.f32 %v810_v47, %v810_v47  ;;  %v912_v8 = vadd.f32 %v911_v50, %v881_v20 }
 0x12b   : > { %v844_v36 = vadd.f32 %v843_v59, %v812_v14  ;;  %v661_v19 = vadd.s32 176, %v1786_v7  ;;  %v692_v12 = vadd.s32 %v1790_v9, %v659_v51  ;;  %vm722_vm4 = vcmp.lt.s32.totalorder %v690_v34, 512 }
 0x12c   : > { %v1305_v24 = vsel %vm720_vm2, 1.0, %v1495_v25  ;;  %v815_v52 = vmul.f32 %v1304_v11, %v1711_v60  ;;  %v884_v39 = vmul.f32 %v811_v58, %v811_v58  ;;  %v913_v59 = vadd.f32 %v912_v8, %v882_v13 }
 0x12d   : > { %v845_v18 = vadd.f32 %v844_v36, %v813_v33  ;;  %v662_v40 = vadd.s32 184, %v1786_v7  ;;  %v693_v30 = vadd.s32 %v1790_v9, %v660_v10  ;;  %vm723_vm5 = vcmp.lt.s32.totalorder %v691_v53, 512 }
 0x12e   : > { %v1306_v47 = vsel %vm721_vm3, 1.0, %v1495_v25  ;;  %v816_v20 = vmul.f32 %v1305_v24, %v1635_v38  ;;  %v885_v46 = vmul.f32 %v812_v14, %v812_v14  ;;  %v914_v36 = vadd.f32 %v913_v59, %v883_v21 }
 0x12f   : > { %v846_v35 = vadd.f32 %v845_v18, %v814_v45  ;;  %v663_v6 = vadd.s32 192, %v1786_v7  ;;  %v694_v50 = vadd.s32 %v1790_v9, %v661_v19  ;;  %vm724_vm6 = vcmp.lt.s32.totalorder %v692_v12, 512 }
 0x130   : > { %v1307_v58 = vsel %vm722_vm4, 1.0, %v1495_v25  ;;  %v817_v13 = vmul.f32 %v1306_v47, %v1645_v44  ;;  %v886_v11 = vmul.f32 %v813_v33, %v813_v33  ;;  %v915_v18 = vadd.f32 %v914_v36, %v884_v39 }
 0x131   : > { %v847_v51 = vadd.f32 %v846_v35, %v815_v52  ;;  %v664_v17 = vadd.s32 200, %v1786_v7  ;;  %v695_v8 = vadd.s32 %v1790_v9, %v662_v40  ;;  %vm725_vm7 = vcmp.lt.s32.totalorder %v693_v30, 512 }
 0x132   : > { %v1308_v14 = vsel %vm723_vm5, 1.0, %v1495_v25  ;;  %v818_v21 = vmul.f32 %v1307_v58, %v1629_v32  ;;  %v887_v24 = vmul.f32 %v814_v45, %v814_v45  ;;  %v916_v35 = vadd.f32 %v915_v18, %v885_v46 }
 0x133   : > { %v848_v10 = vadd.f32 %v847_v51, %v816_v20  ;;  %v665_v34 = vadd.s32 208, %v1786_v7  ;;  %v696_v59 = vadd.s32 %v1790_v9, %v663_v6  ;;  %vm726_vm8 = vcmp.lt.s32.totalorder %v694_v50, 512 }
 0x134   : > { %v1309_v33 = vsel %vm724_vm6, 1.0, %v1495_v25  ;;  %v819_v39 = vmul.f32 %v1308_v14, %v1641_v42  ;;  %v888_v47 = vmul.f32 %v815_v52, %v815_v52  ;;  %v917_v51 = vadd.f32 %v916_v35, %v886_v11 }
 0x135   : > { %v849_v19 = vadd.f32 %v848_v10, %v817_v13  ;;  %v666_v53 = vadd.s32 216, %v1786_v7  ;;  %v697_v36 = vadd.s32 %v1790_v9, %v664_v17  ;;  %vm727_vm9 = vcmp.lt.s32.totalorder %v695_v8, 512 }
 0x136   : > { %v1310_v45 = vsel %vm725_vm7, 1.0, %v1495_v25  ;;  %v820_v46 = vmul.f32 %v1309_v33, %v1659_v62  ;;  %v889_v58 = vmul.f32 %v816_v20, %v816_v20  ;;  %v918_v10 = vadd.f32 %v917_v51, %v887_v24 }
 0x137   : > { %v850_v40 = vadd.f32 %v849_v19, %v818_v21  ;;  %v667_v12 = vadd.s32 224, %v1786_v7  ;;  %v698_v18 = vadd.s32 %v1790_v9, %v665_v34  ;;  %vm728_vm10 = vcmp.lt.s32.totalorder %v696_v59, 512 }
 0x138   : > { %v1311_v52 = vsel %vm726_vm8, 1.0, %v1495_v25  ;;  %v821_v11 = vmul.f32 %v1310_v45, %v1669_v4  ;;  %v890_v14 = vmul.f32 %v817_v13, %v817_v13  ;;  %v919_v19 = vadd.f32 %v918_v10, %v888_v47 }
 0x139   : > { %v851_v6 = vadd.f32 %v850_v40, %v819_v39  ;;  %v668_v30 = vadd.s32 232, %v1786_v7  ;;  %v699_v35 = vadd.s32 %v1790_v9, %v666_v53  ;;  %vm729_vm11 = vcmp.lt.s32.totalorder %v697_v36, 512 }
 0x13a   : > { %v1312_v20 = vsel %vm727_vm9, 1.0, %v1495_v25  ;;  %v822_v24 = vmul.f32 %v1311_v52, %v1653_v56  ;;  %v891_v33 = vmul.f32 %v818_v21, %v818_v21  ;;  %v920_v40 = vadd.f32 %v919_v19, %v889_v58 }
 0x13b   : > { %v852_v17 = vadd.f32 %v851_v6, %v820_v46  ;;  %v669_v50 = vadd.s32 240, %v1786_v7  ;;  %v700_v51 = vadd.s32 %v1790_v9, %v667_v12  ;;  %vm730_vm12 = vcmp.lt.s32.totalorder %v698_v18, 512 }
 0x13c   : > { %v1313_v13 = vsel %vm728_vm10, 1.0, %v1495_v25  ;;  %v823_v47 = vmul.f32 %v1312_v20, %v1665_v2  ;;  %v892_v45 = vmul.f32 %v819_v39, %v819_v39  ;;  %v921_v6 = vadd.f32 %v920_v40, %v890_v14 }
 0x13d   : > { %v853_v34 = vadd.f32 %v852_v17, %v821_v11  ;;  %v670_v8 = vadd.s32 248, %v1786_v7  ;;  %v701_v10 = vadd.s32 %v1790_v9, %v668_v30  ;;  %vm731_vm13 = vcmp.lt.s32.totalorder %v699_v35, 512 }
 0x13e   : > { %v1314_v21 = vsel %vm729_vm11, 1.0, %v1495_v25  ;;  %v824_v58 = vmul.f32 %v1313_v13, %v1683_v23  ;;  %v893_v52 = vmul.f32 %v820_v46, %v820_v46  ;;  %v922_v17 = vadd.f32 %v921_v6, %v891_v33 }
 0x13f   : > { %v854_v53 = vadd.f32 %v853_v34, %v822_v24  ;;  %v702_v59 = vadd.s32 %v1790_v9, %v669_v50  ;;  %vm732_vm14 = vcmp.lt.s32.totalorder %v700_v51, 512  ;;  %v1315_v39 = vsel %vm730_vm12, 1.0, %v1495_v25 }
 0x140   : > { %v825_v14 = vmul.f32 %v1314_v21, %v1693_v29  ;;  %v894_v19 = vmul.f32 %v821_v11, %v821_v11  ;;  %v923_v30 = vadd.f32 %v922_v17, %v892_v45  ;;  %v703_v35 = vadd.s32 %v1790_v9, %v670_v8 }
 0x141   : > { %v855_v12 = vadd.f32 %v854_v53, %v823_v47  ;;  %vm733_vm15 = vcmp.lt.s32.totalorder %v701_v10, 512  ;;  %v1316_v36 = vsel %vm731_vm13, 1.0, %v1495_v25  ;;  %v826_v20 = vmul.f32 %v1315_v39, %v1677_v16 }
 0x142   : > { %v895_v34 = vmul.f32 %v822_v24, %v822_v24  ;;  %v924_v33 = vadd.f32 %v923_v30, %v893_v52  ;;  %vm734_vm0 = vcmp.lt.s32.totalorder %v702_v59, 512  ;;  %v1317_v40 = vsel %vm732_vm14, 1.0, %v1495_v25 }
 0x143   : > { %v856_v7 = vadd.f32 %v855_v12, %v824_v58  ;;  %v827_v18 = vmul.f32 %v1316_v36, %v1689_v27  ;;  %v896_v51 = vmul.f32 %v823_v47, %v823_v47  ;;  %vm735_vm1 = vcmp.lt.s32.totalorder %v703_v35, 512 }
 0x144   : > { %v925_v13 = vadd.f32 %v924_v33, %v894_v19  ;;  %v1318_v11 = vsel %vm733_vm15, 1.0, %v1495_v25  ;;  %v828_v9 = vmul.f32 %v1317_v40, %v1707_v57  ;;  %v897_v45 = vmul.f32 %v824_v58, %v824_v58 }
 0x145   : > { %v857_v46 = vadd.f32 %v856_v7, %v825_v14  ;;  %v1319_v8 = vsel %vm734_vm0, 1.0, %v1495_v25  ;;  %v829_v24 = vmul.f32 %v1318_v11, %v1717_v5  ;;  %v898_v21 = vmul.f32 %v825_v14, %v825_v14 }
 0x146   : > { %v926_v6 = vadd.f32 %v925_v13, %v895_v34  ;;  %v1320_v52 = vsel %vm735_vm1, 1.0, %v1495_v25  ;;  %v830_v47 = vmul.f32 %v1319_v8, %v1701_v49  ;;  %v899_v59 = vmul.f32 %v826_v20, %v826_v20  ;;  %v832_v8 = vld [vmem:[#allocation2] sm:$0x1] }
 0x147   : > { %v858_v50 = vadd.f32 %v857_v46, %v826_v20  ;;  %v831_v7 = vmul.f32 %v1320_v52, %v1713_v63  ;;  %v900_v30 = vmul.f32 %v827_v18, %v827_v18  ;;  %v901_v36 = vmul.f32 %v828_v9, %v828_v9 }
 0x148   : > { %v927_v12 = vadd.f32 %v926_v6, %v896_v51  ;;  %v902_v33 = vmul.f32 %v829_v24, %v829_v24 }
 0x149   : > { %v859_v53 = vadd.f32 %v858_v50, %v827_v18  ;;  %v903_v50 = vmul.f32 %v830_v47, %v830_v47  ;;  %v904_v13 = vmul.f32 %v831_v7, %v831_v7 }
 0x14a   : > { %v928_v39 = vadd.f32 %v927_v12, %v897_v45 }
 0x14b   : > { %v860_v10 = vadd.f32 %v859_v53, %v828_v9 }
 0x14c   : > { %v929_v58 = vadd.f32 %v928_v39, %v898_v21 }
 0x14d   : > { %v861_v17 = vadd.f32 %v860_v10, %v829_v24 }
 0x14e   : > { %v930_v46 = vadd.f32 %v929_v58, %v899_v59 }
 0x14f   : > { %v862_v19 = vadd.f32 %v861_v17, %v830_v47  ;;  %v872_v17 = vld [vmem:[#allocation3] sm:$0x1] }
 0x150   : > { %v931_v40 = vadd.f32 %v930_v46, %v900_v30 }
 0x151   : > { %v863_v35 = vadd.f32 %v862_v19, %v831_v7 }
 0x152   : > { %v932_v51 = vadd.f32 %v931_v40, %v901_v36 }
 0x153   : > { %v864_v34 = vrot.slane %v863_v35, 4 }
 0x154   : > { %v933_v11 = vadd.f32 %v932_v51, %v902_v33 }
 0x155   : > { %v865_v14 = vadd.f32 %v864_v34, %v863_v35 }
 0x156   : > { %v934_v20 = vadd.f32 %v933_v11, %v903_v50 }
 0x157   : > { %v866_v25 = vrot.slane %v865_v14, 2 }
 0x158   : > { %v935_v6 = vadd.f32 %v934_v20, %v904_v13 }
 0x159   : > { %v867_v53 = vadd.f32 %v866_v25, %v865_v14 }
 0x15a   : > { %v936_v18 = vrot.slane %v935_v6, 4 }
 0x15b   : > { %v868_v45 = vrot.slane %v867_v53, 1 }
 0x15c   : > { %v937_v12 = vadd.f32 %v936_v18, %v935_v6 }
 0x15d   : > { %v869_v10 = vadd.f32 %v868_v45, %v867_v53 }
 0x15e   : > { %v938_v9 = vrot.slane %v937_v12, 2 }
 0x15f   : > { %v870_v21 = vadd.f32 %v869_v10, %v832_v8 }
 0x160   : > { %v939_v52 = vadd.f32 %v938_v9, %v937_v12 }
 0x161   : > { %871 = vst [vmem:[#allocation2] sm:$0x1] %v870_v21 }
 0x162   : > { %v940_v24 = vrot.slane %v939_v52, 1 }
 0x164   : > { %v941_v59 = vadd.f32 %v940_v24, %v939_v52 }
 0x166   : > { %v942_v47 = vadd.f32 %v941_v59, %v872_v17 }
 0x168   : > { %943 = vst [vmem:[#allocation3] sm:$0x1] %v942_v47 }
 0x169 PF: > { %p1321_p10 = scmp.ne.s32.totalorder %s1480_s19, 1 }
 0x16a   : > { %v980_v39 = vld [vmem:[#allocation2] sm:$0x1] (!%p1321_p10)  ;;  %v989_v19 = vlaneseq (!%p1321_p10) }
 0x16b   : > { %979 = sbr.rel (%p1321_p10) target bundleno = 418 (0x1a2), region = 52  ;;  %v981_v30 = vmul.f32 (!%p1321_p10), 0.001953125, %v980_v39  ;;  %v2001_v12 = vld [vmem:[%s2210_s3] ss:$0 sm:$0xff] (!%p1321_p10) }
 0x16c   : > { %v990_v35 = vshrl.u32 (!%p1321_p10), %v989_v19, 7  ;;  %v2018_v19 = vld [vmem:[%s2211_s4] ss:$0 sm:$0xff] (!%p1321_p10) }
 0x16d   : > { %v984_v36 = vmul.f32 (!%p1321_p10), %v981_v30, %v981_v30 }
 0x16e   : > { %v991_v34 = vsub.s32 (!%p1321_p10), 0, %v990_v35 }
 0x16f   : > { %v982_v7 = vld [vmem:[#allocation3] sm:$0x1] (!%p1321_p10) }
 0x170   : > { %v983_v58 = vmul.f32 (!%p1321_p10), 0.001953125, %v982_v7  ;;  %v1938_v40 = vrot.slane (!%p1321_p10), %v981_v30, %v991_v34 }
 0x172   : > { %v985_v46 = vsub.f32 %v983_v58, %v984_v36  ;;  %v994_v14 = vsub.f32 %v1633_v37, %v1938_v40  ;;  %v995_v50 = vsub.f32 %v1643_v43, %v1938_v40  ;;  %v996_v51 = vsub.f32 %v1627_v31, %v1938_v40 }
 0x173   : > { %v997_v25 = vsub.f32 %v1639_v41, %v1938_v40  ;;  %v998_v13 = vsub.f32 %v1657_v61, %v1938_v40  ;;  %v999_v11 = vsub.f32 %v1667_v3, %v1938_v40  ;;  %v1000_v53 = vsub.f32 %v1651_v55, %v1938_v40 }
 0x174   : > { %v986_v33 = vadd.f32 1e-05, %v985_v46  ;;  %v1001_v37 = vsub.f32 %v1663_v1, %v1938_v40  ;;  %v1002_v43 = vsub.f32 %v1681_v22, %v1938_v40  ;;  %v1003_v31 = vsub.f32 %v1691_v28, %v1938_v40 }
 0x175   : > { %v1004_v41 = vsub.f32 %v1675_v15, %v1938_v40  ;;  %v1005_v61 = vsub.f32 %v1687_v26, %v1938_v40  ;;  %v1006_v3 = vsub.f32 %v1705_v54, %v1938_v40  ;;  %v1007_v55 = vsub.f32 %v1715_v0, %v1938_v40 }
 0x176   : > { %1452 = vrsqrt.f32 %v986_v33  ;;  %v1008_v1 = vsub.f32 %v1699_v48, %v1938_v40  ;;  %v1009_v22 = vsub.f32 %v1711_v60, %v1938_v40  ;;  %v1010_v28 = vsub.f32 %v1635_v38, %v1938_v40 }
 0x177   : > { %v1011_v15 = vsub.f32 %v1645_v44, %v1938_v40  ;;  %v1012_v26 = vsub.f32 %v1629_v32, %v1938_v40  ;;  %v1013_v54 = vsub.f32 %v1641_v42, %v1938_v40  ;;  %v1014_v0 = vsub.f32 %v1659_v62, %v1938_v40 }
 0x178   : > { %v1015_v48 = vsub.f32 %v1669_v4, %v1938_v40  ;;  %v1016_v60 = vsub.f32 %v1653_v56, %v1938_v40  ;;  %v1017_v45 = vsub.f32 %v1665_v2, %v1938_v40  ;;  %v1018_v6 = vsub.f32 %v1683_v23, %v1938_v40 }
 0x179   : > { %v1019_v10 = vsub.f32 %v1693_v29, %v1938_v40  ;;  %v1020_v18 = vsub.f32 %v1677_v16, %v1938_v40  ;;  %v1021_v21 = vsub.f32 %v1689_v27, %v1938_v40  ;;  %v1022_v9 = vsub.f32 %v1707_v57, %v1938_v40 }
 0x17a   : > { %v1023_v52 = vsub.f32 %v1717_v5, %v1938_v40  ;;  %v1024_v24 = vsub.f32 %v1701_v49, %v1938_v40  ;;  %v1025_v17 = vsub.f32 %v1713_v63, %v1938_v40 }
 0x180   : > { %v1453_v20 = vpop.eup %1452 }
 0x181   : > { %v1990_v8 = vrot.slane %v1453_v20, %v991_v34 }
 0x183   : > { %v1032_v59 = vmul.f32 %v1990_v8, %v994_v14  ;;  %v1033_v47 = vmul.f32 %v1990_v8, %v995_v50  ;;  %v1034_v39 = vmul.f32 %v1990_v8, %v996_v51  ;;  %v1035_v7 = vmul.f32 %v1990_v8, %v997_v25 }
 0x184   : > { %v1036_v30 = vmul.f32 %v1990_v8, %v998_v13  ;;  %v1037_v58 = vmul.f32 %v1990_v8, %v999_v11  ;;  %v1038_v35 = vmul.f32 %v1990_v8, %v1000_v53  ;;  %v1039_v36 = vmul.f32 %v1990_v8, %v1001_v37 }
 0x185   : > { %v1071_v46 = vmul.f32 %v2001_v12, %v1032_v59  ;;  %v1072_v34 = vmul.f32 %v2001_v12, %v1033_v47  ;;  %v1073_v33 = vmul.f32 %v2001_v12, %v1034_v39  ;;  %v1074_v14 = vmul.f32 %v2001_v12, %v1035_v7 }
 0x186   : > { %v1075_v50 = vmul.f32 %v2001_v12, %v1036_v30  ;;  %v1076_v51 = vmul.f32 %v2001_v12, %v1037_v58  ;;  %v1077_v25 = vmul.f32 %v2001_v12, %v1038_v35  ;;  %v1078_v13 = vmul.f32 %v2001_v12, %v1039_v36 }
 0x187   : > { %v1110_v11 = vadd.f32 %v2018_v19, %v1071_v46  ;;  %v1111_v53 = vadd.f32 %v2018_v19, %v1072_v34  ;;  %v1112_v37 = vadd.f32 %v2018_v19, %v1073_v33  ;;  %v1113_v20 = vadd.f32 %v2018_v19, %v1074_v14 }
 0x188   : > { %v1114_v59 = vadd.f32 %v2018_v19, %v1075_v50  ;;  %v1115_v47 = vadd.f32 %v2018_v19, %v1076_v51  ;;  %v1116_v39 = vadd.f32 %v2018_v19, %v1077_v25  ;;  %v1117_v7 = vadd.f32 %v2018_v19, %v1078_v13 }
 0x189   : > { %1142 = vst [vmem:[%s1578_s14] sm:$0xff] %v1110_v11  ;;  %1143 = vst [vmem:[%s1578_s14 + $0x8] sm:$0xff] %v1111_v53  ;;  %v1040_v30 = vmul.f32 %v1990_v8, %v1002_v43  ;;  %v1041_v58 = vmul.f32 %v1990_v8, %v1003_v31  ;;  %v1042_v35 = vmul.f32 %v1990_v8, %v1004_v41 }
 0x18a   : > { %1144 = vst [vmem:[%s1578_s14 + $0x10] sm:$0xff] %v1112_v37  ;;  %1145 = vst [vmem:[%s1578_s14 + $0x18] sm:$0xff] %v1113_v20  ;;  %v1043_v36 = vmul.f32 %v1990_v8, %v1005_v61  ;;  %v1044_v46 = vmul.f32 %v1990_v8, %v1006_v3  ;;  %v1045_v34 = vmul.f32 %v1990_v8, %v1007_v55 }
 0x18b   : > { %1146 = vst [vmem:[%s1578_s14 + $0x20] sm:$0xff] %v1114_v59  ;;  %1147 = vst [vmem:[%s1578_s14 + $0x28] sm:$0xff] %v1115_v47  ;;  %v1046_v33 = vmul.f32 %v1990_v8, %v1008_v1  ;;  %v1047_v14 = vmul.f32 %v1990_v8, %v1009_v22  ;;  %v1079_v43 = vmul.f32 %v2001_v12, %v1040_v30 }
 0x18c   : > { %1148 = vst [vmem:[%s1578_s14 + $0x30] sm:$0xff] %v1116_v39  ;;  %1149 = vst [vmem:[%s1578_s14 + $0x38] sm:$0xff] %v1117_v7  ;;  %v1080_v31 = vmul.f32 %v2001_v12, %v1041_v58  ;;  %v1081_v41 = vmul.f32 %v2001_v12, %v1042_v35  ;;  %v1082_v61 = vmul.f32 %v2001_v12, %v1043_v36 }
 0x18d   : > { %v1083_v3 = vmul.f32 %v2001_v12, %v1044_v46  ;;  %v1084_v55 = vmul.f32 %v2001_v12, %v1045_v34  ;;  %v1085_v1 = vmul.f32 %v2001_v12, %v1046_v33  ;;  %v1086_v22 = vmul.f32 %v2001_v12, %v1047_v14 }
 0x18e   : > { %v1118_v50 = vadd.f32 %v2018_v19, %v1079_v43  ;;  %v1119_v51 = vadd.f32 %v2018_v19, %v1080_v31  ;;  %v1120_v25 = vadd.f32 %v2018_v19, %v1081_v41  ;;  %v1121_v13 = vadd.f32 %v2018_v19, %v1082_v61 }
 0x18f   : > { %v1122_v11 = vadd.f32 %v2018_v19, %v1083_v3  ;;  %v1123_v53 = vadd.f32 %v2018_v19, %v1084_v55  ;;  %v1124_v37 = vadd.f32 %v2018_v19, %v1085_v1  ;;  %v1125_v20 = vadd.f32 %v2018_v19, %v1086_v22 }
 0x190   : > { %1150 = vst [vmem:[%s1578_s14 + $0x40] sm:$0xff] %v1118_v50  ;;  %1151 = vst [vmem:[%s1578_s14 + $0x48] sm:$0xff] %v1119_v51  ;;  %v1048_v59 = vmul.f32 %v1990_v8, %v1010_v28  ;;  %v1049_v47 = vmul.f32 %v1990_v8, %v1011_v15  ;;  %v1050_v39 = vmul.f32 %v1990_v8, %v1012_v26 }
 0x191   : > { %1152 = vst [vmem:[%s1578_s14 + $0x50] sm:$0xff] %v1120_v25  ;;  %1153 = vst [vmem:[%s1578_s14 + $0x58] sm:$0xff] %v1121_v13  ;;  %v1051_v7 = vmul.f32 %v1990_v8, %v1013_v54  ;;  %v1052_v38 = vmul.f32 %v1990_v8, %v1014_v0  ;;  %v1053_v32 = vmul.f32 %v1990_v8, %v1015_v48 }
 0x192   : > { %1154 = vst [vmem:[%s1578_s14 + $0x60] sm:$0xff] %v1122_v11  ;;  %1155 = vst [vmem:[%s1578_s14 + $0x68] sm:$0xff] %v1123_v53  ;;  %v1054_v42 = vmul.f32 %v1990_v8, %v1016_v60  ;;  %v1055_v44 = vmul.f32 %v1990_v8, %v1017_v45  ;;  %v1087_v28 = vmul.f32 %v2001_v12, %v1048_v59 }
 0x193   : > { %1156 = vst [vmem:[%s1578_s14 + $0x70] sm:$0xff] %v1124_v37  ;;  %1157 = vst [vmem:[%s1578_s14 + $0x78] sm:$0xff] %v1125_v20  ;;  %v1088_v62 = vmul.f32 %v2001_v12, %v1049_v47  ;;  %v1089_v4 = vmul.f32 %v2001_v12, %v1050_v39  ;;  %v1090_v15 = vmul.f32 %v2001_v12, %v1051_v7 }
 0x194   : > { %v1091_v56 = vmul.f32 %v2001_v12, %v1052_v38  ;;  %v1092_v26 = vmul.f32 %v2001_v12, %v1053_v32  ;;  %v1093_v2 = vmul.f32 %v2001_v12, %v1054_v42  ;;  %v1094_v54 = vmul.f32 %v2001_v12, %v1055_v44 }
 0x195   : > { %v1126_v0 = vadd.f32 %v2018_v19, %v1087_v28  ;;  %v1127_v48 = vadd.f32 %v2018_v19, %v1088_v62  ;;  %v1128_v60 = vadd.f32 %v2018_v19, %v1089_v4  ;;  %v1129_v45 = vadd.f32 %v2018_v19, %v1090_v15 }
 0x196   : > { %v1130_v30 = vadd.f32 %v2018_v19, %v1091_v56  ;;  %v1131_v58 = vadd.f32 %v2018_v19, %v1092_v26  ;;  %v1132_v35 = vadd.f32 %v2018_v19, %v1093_v2  ;;  %v1133_v36 = vadd.f32 %v2018_v19, %v1094_v54 }
 0x197   : > { %1158 = vst [vmem:[%s1578_s14 + $0x80] sm:$0xff] %v1126_v0  ;;  %1159 = vst [vmem:[%s1578_s14 + $0x88] sm:$0xff] %v1127_v48  ;;  %v1056_v46 = vmul.f32 %v1990_v8, %v1018_v6  ;;  %v1057_v34 = vmul.f32 %v1990_v8, %v1019_v10  ;;  %v1058_v33 = vmul.f32 %v1990_v8, %v1020_v18 }
 0x198   : > { %1160 = vst [vmem:[%s1578_s14 + $0x90] sm:$0xff] %v1128_v60  ;;  %1161 = vst [vmem:[%s1578_s14 + $0x98] sm:$0xff] %v1129_v45  ;;  %v1059_v14 = vmul.f32 %v1990_v8, %v1021_v21  ;;  %v1060_v23 = vmul.f32 %v1990_v8, %v1022_v9  ;;  %v1061_v16 = vmul.f32 %v1990_v8, %v1023_v52 }
 0x199   : > { %1162 = vst [vmem:[%s1578_s14 + $0xa0] sm:$0xff] %v1130_v30  ;;  %1163 = vst [vmem:[%s1578_s14 + $0xa8] sm:$0xff] %v1131_v58  ;;  %v1062_v27 = vmul.f32 %v1990_v8, %v1024_v24  ;;  %v1063_v29 = vmul.f32 %v1990_v8, %v1025_v17  ;;  %v1095_v6 = vmul.f32 %v2001_v12, %v1056_v46 }
 0x19a   : > { %1164 = vst [vmem:[%s1578_s14 + $0xb0] sm:$0xff] %v1132_v35  ;;  %1165 = vst [vmem:[%s1578_s14 + $0xb8] sm:$0xff] %v1133_v36  ;;  %v1096_v57 = vmul.f32 %v2001_v12, %v1057_v34  ;;  %v1097_v5 = vmul.f32 %v2001_v12, %v1058_v33  ;;  %v1098_v10 = vmul.f32 %v2001_v12, %v1059_v14 }
 0x19b   : > { %v1099_v49 = vmul.f32 %v2001_v12, %v1060_v23  ;;  %v1100_v18 = vmul.f32 %v2001_v12, %v1061_v16  ;;  %v1101_v63 = vmul.f32 %v2001_v12, %v1062_v27  ;;  %v1102_v40 = vmul.f32 %v2001_v12, %v1063_v29 }
 0x19c   : > { %v1134_v8 = vadd.f32 %v2018_v19, %v1095_v6  ;;  %v1135_v21 = vadd.f32 %v2018_v19, %v1096_v57  ;;  %v1136_v9 = vadd.f32 %v2018_v19, %v1097_v5  ;;  %v1137_v52 = vadd.f32 %v2018_v19, %v1098_v10 }
 0x19d   : > { %v1138_v24 = vadd.f32 %v2018_v19, %v1099_v49  ;;  %v1139_v17 = vadd.f32 %v2018_v19, %v1100_v18  ;;  %v1140_v43 = vadd.f32 %v2018_v19, %v1101_v63  ;;  %v1141_v31 = vadd.f32 %v2018_v19, %v1102_v40 }
 0x19e   : > { %1166 = vst [vmem:[%s1578_s14 + $0xc0] sm:$0xff] %v1134_v8  ;;  %1167 = vst [vmem:[%s1578_s14 + $0xc8] sm:$0xff] %v1135_v21 }
 0x19f   : > { %1168 = vst [vmem:[%s1578_s14 + $0xd0] sm:$0xff] %v1136_v9  ;;  %1169 = vst [vmem:[%s1578_s14 + $0xd8] sm:$0xff] %v1137_v52 }
 0x1a0   : > { %1170 = vst [vmem:[%s1578_s14 + $0xe0] sm:$0xff] %v1138_v24  ;;  %1171 = vst [vmem:[%s1578_s14 + $0xe8] sm:$0xff] %v1139_v17 }
 0x1a1   : > { %1172 = vst [vmem:[%s1578_s14 + $0xf0] sm:$0xff] %v1140_v43  ;;  %1173 = vst [vmem:[%s1578_s14 + $0xf8] sm:$0xff] %v1141_v31 }
 0x1a2 PF: > { %s15_s22 = sadd.s32 1, %s1492_s22   ;;  %s2214_s18 = smov %s1484_s20 }
 0x1a3   : > { %p12_p11 = scmp.ge.s32.totalorder %s15_s22, 6   ;;  %s2215_s19 = smov %s1488_s21 }
 0x1a4   : > { %s2216_s20 = smov %s2219_s23  ;;  %s2217_s21 = smov %s2223_s24 }
 0x1a5   :  { %14 = sbr.rel (!%p12_p11) target bundleno = 3 (0x3), region = 82 }

</bundles_post_ra>
